<compile_context>
chip_gen: v6e
topology: v6e:2x2x1
jax: 0.10.0
libtpu: 0.0.40
codegen_flags: <defaults>
</compile_context>

<pallas_src>
import functools

import jax
import jax.numpy as jnp
from jax.experimental import pallas as pl
from jax.experimental.pallas import tpu as pltpu

TM_MAX = 512    # M (row) tile for the fused conv/fc matmul kernel
TN_MAX = 128    # N (output-channel) tile — keeps output stores lane-dense when N >= 128
TK_MAX = 1536   # split K when larger than this (only when it splits into 128-multiples)


# ---------------------------------------------------------------------------
# Pallas kernels
# ---------------------------------------------------------------------------
def _fused_matmul_kernel(a_ref, w_ref, shift_ref, o_ref, acc_ref, *, apply_relu):
    """o = relu?( (a @ w) + shift ) with f32 accumulation over the K grid axis."""
    @pl.when(pl.program_id(2) == 0)
    def _():
        acc_ref[...] = jnp.zeros_like(acc_ref)

    acc_ref[...] += jnp.dot(a_ref[...], w_ref[...],
                            preferred_element_type=jnp.float32)

    @pl.when(pl.program_id(2) == pl.num_programs(2) - 1)
    def _():
        acc = acc_ref[...] + shift_ref[...]
        if apply_relu:
            acc = jnp.maximum(acc, 0.0)
        o_ref[...] = acc.astype(o_ref.dtype)


def _maxpool_kernel(x_ref, o_ref, *, c):
    """2x2/stride-2 max pool.

    Input block is (TR, 2, W2, 2*C): row-pairs in dim 1, column-pairs folded
    into the (lane) last dim as [col0 | col1] groups of C channels each."""
    xb = x_ref[...]
    m = jnp.maximum(xb[:, 0, :, :], xb[:, 1, :, :])      # vertical max  -> (TR, W2, 2C)
    o_ref[...] = jnp.maximum(m[:, :, :c], m[:, :, c:])   # horizontal max -> (TR, W2, C)


def _global_mean_kernel(x_ref, o_ref):
    """AdaptiveAvgPool2d(1): mean over the flattened spatial axis (f32 accumulate)."""
    o_ref[...] = jnp.mean(x_ref[...].astype(jnp.float32), axis=1,
                          keepdims=True).astype(o_ref.dtype)


# ---------------------------------------------------------------------------
# Pallas wrappers
# ---------------------------------------------------------------------------
def fused_matmul(a, w, shift, *, relu, out_dtype=jnp.bfloat16):
    """(M,K) @ (K,N) + shift (+ReLU), bf16 operands, f32 accumulation.

    M is tiled (ragged final tile masked by Pallas), N tiled at 128, K tiled
    when large (reduction axis last, marked 'arbitrary', f32 VMEM accumulator)."""
    a = a.astype(jnp.bfloat16)
    w = w.astype(jnp.bfloat16)
    M, K = a.shape
    K2, N = w.shape
    assert K == K2
    shift = shift.astype(jnp.float32).reshape(1, N)

    tm = min(TM_MAX, M)                 # either == M (full) or a multiple of 8
    tn = N if N <= TN_MAX else TN_MAX   # lane-dense (>=128) whenever N allows
    nk = pl.cdiv(K, TK_MAX)
    if nk > 1 and K % nk == 0 and (K // nk) % 128 == 0:
        tk = K // nk
    else:
        tk, nk = K, 1

    grid = (pl.cdiv(M, tm), pl.cdiv(N, tn), nk)
    return pl.pallas_call(
        functools.partial(_fused_matmul_kernel, apply_relu=relu),
        out_shape=jax.ShapeDtypeStruct((M, N), out_dtype),
        grid=grid,
        in_specs=[
            pl.BlockSpec((tm, tk), lambda i, j, k: (i, k)),
            pl.BlockSpec((tk, tn), lambda i, j, k: (k, j)),
            pl.BlockSpec((1, tn), lambda i, j, k: (0, j)),
        ],
        out_specs=pl.BlockSpec((tm, tn), lambda i, j, k: (i, j)),
        scratch_shapes=[pltpu.VMEM((tm, tn), jnp.float32)],
        compiler_params=pltpu.CompilerParams(
            dimension_semantics=("parallel", "parallel", "arbitrary"),
            vmem_limit_bytes=48 * 1024 * 1024,
        ),
    )(a, w, shift)


def maxpool_2x2(x):
    """nn.MaxPool2d(2) on NHWC (kernel=2, stride=2, floor) — single-input, gridded."""
    B, H, W, C = x.shape
    H2, W2 = H // 2, W // 2
    xt = x[:, : H2 * 2, : W2 * 2, :]
    xr = xt.reshape(B * H2, 2, W2, 2 * C)    # free reshape: row-pairs / col-pairs
    BH = B * H2
    tr = min(256, BH)
    out = pl.pallas_call(
        functools.partial(_maxpool_kernel, c=C),
        out_shape=jax.ShapeDtypeStruct((BH, W2, C), x.dtype),
        grid=(pl.cdiv(BH, tr),),
        in_specs=[pl.BlockSpec((tr, 2, W2, 2 * C), lambda i: (i, 0, 0, 0))],
        out_specs=pl.BlockSpec((tr, W2, C), lambda i: (i, 0, 0)),
        compiler_params=pltpu.CompilerParams(dimension_semantics=("parallel",)),
    )(xr)
    return out.reshape(B, H2, W2, C)


def adaptive_avgpool_1(x):
    """nn.AdaptiveAvgPool2d(1) on NHWC, gridded over batch."""
    B, H, W, C = x.shape
    xr = x.reshape(B, H * W, C)
    tb = min(8, B)
    out = pl.pallas_call(
        _global_mean_kernel,
        out_shape=jax.ShapeDtypeStruct((B, 1, C), x.dtype),
        grid=(pl.cdiv(B, tb),),
        in_specs=[pl.BlockSpec((tb, H * W, C), lambda i: (i, 0, 0))],
        out_specs=pl.BlockSpec((tb, 1, C), lambda i: (i, 0, 0)),
        compiler_params=pltpu.CompilerParams(dimension_semantics=("parallel",)),
    )(xr)
    return out.reshape(B, 1, 1, C)


# ---------------------------------------------------------------------------
# Conv / ConvBlock / encoder forward (glue in plain JAX, compute in Pallas)
# ---------------------------------------------------------------------------
def _im2col(x, k, stride):
    B, H, W, C = x.shape
    OH = (H - k) // stride + 1
    OW = (W - k) // stride + 1
    cols = []
    for i in range(k):
        for j in range(k):
            cols.append(x[:, i: i + (OH - 1) * stride + 1: stride,
                           j: j + (OW - 1) * stride + 1: stride, :])
    patches = jnp.concatenate(cols, axis=-1)          # (B, OH, OW, k*k*C) bf16
    return patches.reshape(B * OH * OW, k * k * C), (B, OH, OW)


# TODO(synk): im2col patch matrix is still materialized in HBM (in bf16); a fully
# fused in-kernel 9-tap conv (shifted-window DMA) would remove it but is left out.
def conv2d_fused(x, layer, *, stride, relu, out_dtype=jnp.bfloat16):
    w = layer["w"]                                     # (kh, kw, cin, cout) — HWIO, BN scale folded in
    kh, kw, cin, cout = w.shape
    patches, (B, OH, OW) = _im2col(x, kh, stride)
    y = fused_matmul(patches, w.reshape(kh * kw * cin, cout),
                     layer["shift"], relu=relu, out_dtype=out_dtype)
    return y.reshape(B, OH, OW, cout)


def conv_block_forward(x, blk):
    x = conv2d_fused(x, blk["conv1"], stride=1, relu=True)
    x = conv2d_fused(x, blk["conv2"], stride=1, relu=True)
    if blk["pool"] == "max_2":
        x = maxpool_2x2(x)
    elif blk["pool"] == "adap":
        x = adaptive_avgpool_1(x)
    return x


def cnn_encoder_forward(params, x_nchw):
    x = jnp.transpose(x_nchw, (0, 2, 3, 1)).astype(jnp.bfloat16)  # NCHW -> NHWC, bf16 activations
    x = conv2d_fused(x, params["conv1"], stride=2, relu=False)    # conv1: no BN / no act
    for blk in params["blocks"]:
        x = conv_block_forward(x, blk)
    x = conv_block_forward(x, params["conv2"])                    # ends with adap pool (B,1,1,C)
    feat = x.reshape(x.shape[0], -1)                              # == torch.flatten(out, 1)
    fc = params["fc"]
    return fused_matmul(feat, fc["w"], fc["shift"], relu=False, out_dtype=jnp.float32)


# ---------------------------------------------------------------------------
# Deterministic parameter construction (mirrors CNN_Encoder.__init__ logic)
# ---------------------------------------------------------------------------
def _init_conv(key, cin, cout, k=3, use_bn=True, eps=1e-5):
    kw_, kb_, kg_, kbe_, km_, kv_ = jax.random.split(key, 6)
    fan_in = cin * k * k
    w = jax.random.normal(kw_, (k, k, cin, cout), jnp.float32) * jnp.sqrt(2.0 / fan_in)
    b = 0.01 * jax.random.normal(kb_, (cout,), jnp.float32)
    if use_bn:
        # eval-mode BatchNorm folded: scale into the weights, rest into shift.
        gamma = 1.0 + 0.1 * jax.random.normal(kg_, (cout,), jnp.float32)
        beta = 0.1 * jax.random.normal(kbe_, (cout,), jnp.float32)
        rmean = 0.05 * jax.random.normal(km_, (cout,), jnp.float32)
        rvar = 1.0 + 0.1 * jax.random.uniform(kv_, (cout,), jnp.float32)
        scale = gamma / jnp.sqrt(rvar + eps)
        shift = (b - rmean) * scale + beta
        w = w * scale                          # per-output-channel fold (broadcast over cout)
    else:
        shift = b
    return {"w": w, "shift": shift}


def _init_block(key, cin, cout, use_bn, pool):
    k1, k2 = jax.random.split(key)
    return {"conv1": _init_conv(k1, cin, cout, 3, use_bn),
            "conv2": _init_conv(k2, cout, cout, 3, use_bn),
            "pool": pool}


def init_cnn_encoder(key, channel_out=512, n_layers=6, use_batchnorm=True, channel_in=3):
    channels = [64, 128, 256, 512]
    if n_layers < 1 or n_layers > len(channels) * 2:
        raise ValueError("invalid n_layers")
    n_repeat = remainder = max(0, n_layers - len(channels))
    pointer = 0
    keys = jax.random.split(key, n_layers + 3)

    params = {"conv1": _init_conv(keys[0], channel_in, channels[0], 3, use_bn=False)}
    # TODO(synk): self.maxpool = nn.MaxPool2d(3, 2) is defined but never used in forward — omitted.
    # TODO(synk): only the default 'relu' activation path is implemented (no leaky/param relu).

    blocks = []
    if n_layers > 1:
        blocks.append(_init_block(keys[1], channels[0], channels[0], use_batchnorm, "max_2"))
    for i in range(1, n_layers - 1):
        if i % 2 == 0 and remainder > 0:
            blocks.append(_init_block(keys[1 + i], channels[pointer], channels[pointer],
                                      use_batchnorm, None))
            remainder -= 1
        else:
            blocks.append(_init_block(keys[1 + i], channels[pointer],
                                      channels[min(pointer + 1, len(channels) - 1)],
                                      use_batchnorm, "max_2"))
            pointer += 1
    params["blocks"] = blocks

    if n_layers < len(channels):
        conv_to_fc = channels[n_layers - 1 - n_repeat]
    else:
        conv_to_fc = channels[-1]
    params["conv2"] = _init_block(keys[n_layers], channels[n_layers - 2 - n_repeat],
                                  conv_to_fc, use_batchnorm, "adap")

    kfc_w, kfc_b = jax.random.split(keys[n_layers + 1])
    bound = 1.0 / (conv_to_fc ** 0.5)
    fc_w = jax.random.uniform(kfc_w, (conv_to_fc, channel_out), jnp.float32, -bound, bound)
    fc_b = jax.random.uniform(kfc_b, (channel_out,), jnp.float32, -bound, bound)
    params["fc"] = {"w": fc_w, "shift": fc_b}
    return params


# ---------------------------------------------------------------------------
if __name__ == "__main__":
    root = jax.random.PRNGKey(0)
    kx, kp = jax.random.split(root)

    # Small config implied by the module: n_layers=3 -> conv1(3->64,s2),
    # ConvBlock(64->64,max2), ConvBlock(64->128,max2), ConvBlock(128->256,adap), fc(256->64).
    B, C_IN, H, W = 2, 3, 65, 65
    N_LAYERS, C_OUT = 3, 64

    x = jax.random.normal(kx, (B, C_IN, H, W), jnp.float32)      # PyTorch-style NCHW input
    params = init_cnn_encoder(kp, channel_out=C_OUT, n_layers=N_LAYERS,
                              use_batchnorm=True, channel_in=C_IN)

    out = cnn_encoder_forward(params, x)
    out = jax.block_until_ready(out)

    assert out.shape == (B, C_OUT), out.shape
    assert bool(jnp.all(jnp.isfinite(out)))
    print("KERNEL_OK")
</pallas_src>

<mosaic_0001>
module attributes {stable_mosaic.version = 11 : i64} {
  func.func @_fused_matmul_kernel(%arg0: i32, %arg1: i32, %arg2: i32, %arg3: memref<512x27xbf16, #tpu.memory_space<vmem>>, %arg4: memref<27x64xbf16, #tpu.memory_space<vmem>>, %arg5: memref<1x64xf32, #tpu.memory_space<vmem>>, %arg6: memref<512x64xbf16, #tpu.memory_space<vmem>>, %arg7: memref<512x64xf32, #tpu.memory_space<vmem>>) attributes {dimension_semantics = [#tpu.dimension_semantics<parallel>, #tpu.dimension_semantics<parallel>, #tpu.dimension_semantics<arbitrary>], iteration_bounds = array<i64: 4, 1, 1>, scalar_prefetch = 0 : i64, scratch_operands = 1 : i64, tpu.core_type = #tpu.core_type<tc>, window_params = [{transform_indices = @transform_0, window_bounds = array<i64: 512, 27>}, {transform_indices = @transform_1, window_bounds = array<i64: 27, 64>}, {transform_indices = @transform_2, window_bounds = array<i64: 1, 64>}, {transform_indices = @transform_3, window_bounds = array<i64: 512, 64>}]} {
    %c0_i32 = arith.constant 0 : i32
    %0 = arith.cmpi eq, %arg2, %c0_i32 : i32
    %1 = arith.extui %0 : i1 to i32
    %c0_i32_0 = arith.constant 0 : i32
    %2 = arith.cmpi ne, %1, %c0_i32_0 : i32
    scf.if %2 {
      %cst_10 = arith.constant 0.000000e+00 : f32
      %12 = vector.broadcast %cst_10 : f32 to vector<512x64xf32>
      %c0_11 = arith.constant 0 : index
      %c0_12 = arith.constant 0 : index
      %13 = vector.load %arg7[%c0_11, %c0_12] : memref<512x64xf32, #tpu.memory_space<vmem>>, vector<512x64xf32>
      tpu.vector_store %arg7[%c0_11, %c0_12], %12 {strides = array<i32>} : memref<512x64xf32, #tpu.memory_space<vmem>>, vector<512x64xf32>,
    } else {
    }
    %c0 = arith.constant 0 : index
    %c0_1 = arith.constant 0 : index
    %3 = vector.load %arg7[%c0, %c0_1] : memref<512x64xf32, #tpu.memory_space<vmem>>, vector<512x64xf32>
    %c0_2 = arith.constant 0 : index
    %c0_3 = arith.constant 0 : index
    %4 = vector.load %arg3[%c0_2, %c0_3] : memref<512x27xbf16, #tpu.memory_space<vmem>>, vector<512x27xbf16>
    %c0_4 = arith.constant 0 : index
    %c0_5 = arith.constant 0 : index
    %5 = vector.load %arg4[%c0_4, %c0_5] : memref<27x64xbf16, #tpu.memory_space<vmem>>, vector<27x64xbf16>
    %cst = arith.constant dense<0.000000e+00> : vector<512x64xf32>
    %6 = tpu.matmul %4, %5, %cst {dimension_numbers = #tpu.dot_dimension_numbers<[1], [0], [0], [1], [0, 0, 1, 1], [], []>} : vector<512x27xbf16>, vector<27x64xbf16>, vector<512x64xf32> -> vector<512x64xf32>
    %7 = arith.addf %3, %6 : vector<512x64xf32>
    %c0_6 = arith.constant 0 : index
    %c0_7 = arith.constant 0 : index
    %8 = vector.load %arg7[%c0_6, %c0_7] : memref<512x64xf32, #tpu.memory_space<vmem>>, vector<512x64xf32>
    tpu.vector_store %arg7[%c0_6, %c0_7], %7 {strides = array<i32>} : memref<512x64xf32, #tpu.memory_space<vmem>>, vector<512x64xf32>,
    %c0_i32_8 = arith.constant 0 : i32
    %9 = arith.cmpi eq, %arg2, %c0_i32_8 : i32
    %10 = arith.extui %9 : i1 to i32
    %c0_i32_9 = arith.constant 0 : i32
    %11 = arith.cmpi ne, %10, %c0_i32_9 : i32
    scf.if %11 {
      %c0_10 = arith.constant 0 : index
      %c0_11 = arith.constant 0 : index
      %12 = vector.load %arg7[%c0_10, %c0_11] : memref<512x64xf32, #tpu.memory_space<vmem>>, vector<512x64xf32>
      %c0_12 = arith.constant 0 : index
      %c0_13 = arith.constant 0 : index
      %13 = vector.load %arg5[%c0_12, %c0_13] : memref<1x64xf32, #tpu.memory_space<vmem>>, vector<1x64xf32>
      %14 = vector.broadcast %13 : vector<1x64xf32> to vector<512x64xf32>
      %15 = arith.addf %12, %14 : vector<512x64xf32>
      %16 = arith.truncf %15 : vector<512x64xf32> to vector<512x64xbf16>
      %c0_14 = arith.constant 0 : index
      %c0_15 = arith.constant 0 : index
      %17 = vector.load %arg6[%c0_14, %c0_15] : memref<512x64xbf16, #tpu.memory_space<vmem>>, vector<512x64xbf16>
      tpu.vector_store %arg6[%c0_14, %c0_15], %16 {strides = array<i32>} : memref<512x64xbf16, #tpu.memory_space<vmem>>, vector<512x64xbf16>,
    } else {
    }
    return
  }
  func.func @transform_0(%arg0: i32, %arg1: i32, %arg2: i32) -> (i32, i32) {
    %c0_i32 = arith.constant 0 : i32
    return %arg0, %arg2 : i32, i32
  }
  func.func @transform_1(%arg0: i32, %arg1: i32, %arg2: i32) -> (i32, i32) {
    %c0_i32 = arith.constant 0 : i32
    return %arg2, %arg1 : i32, i32
  }
  func.func @transform_2(%arg0: i32, %arg1: i32, %arg2: i32) -> (i32, i32) {
    %c0_i32 = arith.constant 0 : i32
    %c0_i32_0 = arith.constant 0 : i32
    return %c0_i32, %arg1 : i32, i32
  }
  func.func @transform_3(%arg0: i32, %arg1: i32, %arg2: i32) -> (i32, i32) {
    %c0_i32 = arith.constant 0 : i32
    return %arg0, %arg1 : i32, i32
  }
}

</mosaic_0001>

<bundles_post_ra>
// kernel: tpu_custom_call.1
= control target key start
LH: loop header
LB: loop body
LE: loop exit
PB: predicated region body
PF: predicated region fallthrough
CT: control target
= control target key end

     0   :  { %s2144_s12 = smov 0   ;;  %s2146_s13 = smov 0   ;;  %s2672_s0 = inlined_call_operand.vmem [shape: bf16[2048,27], index: 0, kind: input, shape index: {}]   ;;  %s2673_s1 = inlined_call_operand.vmem [shape: bf16[27,64], index: 1, kind: input, shape index: {}]   ;;  %s2674_s2 = inlined_call_operand.vmem [shape: f32[1,64], index: 2, kind: input, shape index: {}]   ;;  %s2675_s3 = inlined_call_operand.vmem [shape: bf16[2048,64], index: 3, kind: output, shape index: {}]  }
   0x1   :  { %s2148_s14 = smov 0  }
   0x2 LB: > { %s32_s15 = sadd.s32 1, %s2116_s13  ;;  %p1730_p0 = scmp.ge.s32.totalorder %s2120_s14, 1  ;;  %s2120_s14 = sphi %s2148_s14, %s13_s14   ;;  %s2116_s13 = sphi %s2146_s13, %s2678_s13   ;;  %s2112_s12 = sphi %s2144_s12, %s2677_s12  }
   0x3   : > { %p34_p1 = scmp.ge.s32.totalorder %s32_s15, 4  ;;  %p188_p2 = scmp.lt.s32.totalorder %s2120_s14, 5 }
   0x5   : > { %s2680_s15 = smov (%p34_p1, %s32_s15), 0  ;;  %p189_p3 = pnand %p1730_p0, %p188_p2 }
   0x6   : > { %s1731_s18 = sshll.u32 (!%p189_p3), %s2112_s12, 6 }
   0x7   : > { %192 = sbr.rel (%p189_p3) target bundleno = 302 (0x12e), region = 32  ;;  %p2170_p4 = scmp.lt.s32.totalorder (!%p189_p3), %s1731_s18, 255 }
   0xc   : > { %v2064_v0 = vld [vmem:[%s2673_s1 + $0x8] sm:$0x3f]   ;;  %vm729_vm0 = vcmask 1044480   ;;  %vm730_vm1 = vcmask 1045504   ;;  %v2122_v1 = vmov 65535   ;;  %vm264_vm2 = vcmask 523264  }
   0xd   : > { %v731_v2 = vsel %vm729_vm0, 4294967295, %v2122_v1  ;;  %v2179_v5 = vld [vmem:[%s2673_s1] sm:$0xff]   ;;  %v2123_v6 = vmov 0.0   ;;  %s2682_s18 = smov (!%p2170_p4, %s1731_s18), 255  ;;  %vm632_vm3 = vcmask 220160   ;;  %vm1548_vm4 = vcmask 519168  }
   0xe   : > { %v732_v3 = vsel %vm730_vm1, %v731_v2, 0  ;;  %267 = vst.msk [vmem:[#allocation2 + $0x10] sm:$0xff] %vm264_vm2, %v2123_v6  ;;  %265 = vst.msk [vmem:[#allocation2] sm:$0xff] %vm264_vm2, %v2123_v6  ;;  %s1732_s22 = sshll.u32 %s2682_s18, 2  ;;  %v2404_v1 = vld [vmem:[%s2674_s2] ss:$0 sm:$0xff] }
   0xf   : > { %v2174_v4 = vand.u32 %v2064_v0, %v732_v3  ;;  %266 = vst.msk [vmem:[#allocation2 + $0x8] sm:$0xff] %vm264_vm2, %v2123_v6  ;;  %268 = vst.msk [vmem:[#allocation2 + $0x18] sm:$0xff] %vm264_vm2, %v2123_v6  ;;  %s2327_s25 = scalar_lea.vmem %s2672_s0, %s1732_s22  ;;  %s2417_s30 = scalar_lea.vmem %s2675_s3, %s1732_s22 }
  0x10   : > { %269 = vst.msk [vmem:[#allocation2 + $0x20] sm:$0xff] %vm264_vm2, %v2123_v6  ;;  %270 = vst.msk [vmem:[#allocation2 + $0x28] sm:$0xff] %vm264_vm2, %v2123_v6  ;;  %v2066_v7 = vld [vmem:[%s2327_s25] sm:$0xff]   ;;  %v2068_v9 = vld [vmem:[%s2327_s25 + $0x8] sm:$0xff]  }
  0x11   : > { %271 = vst.msk [vmem:[#allocation2 + $0x30] sm:$0xff] %vm264_vm2, %v2123_v6  ;;  %272 = vst.msk [vmem:[#allocation2 + $0x38] sm:$0xff] %vm264_vm2, %v2123_v6  ;;  %1966 = vmatprep.subr.bf16.mxu0 %v2174_v4  ;;  %2034 = vmatprep.subr.bf16.mxu1 %v2174_v4  ;;  %v2067_v8 = vld [vmem:[%s2327_s25 + $0x80] sm:$0xff]   ;;  %v2069_v10 = vld [vmem:[%s2327_s25 + $0x88] sm:$0xff]  }
  0x12   : > { %273 = vst.msk [vmem:[#allocation2 + $0x40] sm:$0xff] %vm264_vm2, %v2123_v6  ;;  %274 = vst.msk [vmem:[#allocation2 + $0x48] sm:$0xff] %vm264_vm2, %v2123_v6  ;;  %1967 = vmatpush3.bf16.msra.mxu0 %v2174_v4  ;;  %2036 = vmatpush3.bf16.msra.mxu1 %v2174_v4  ;;  %v2070_v11 = vld [vmem:[%s2327_s25 + $0x10] sm:$0xff]   ;;  %v2072_v13 = vld [vmem:[%s2327_s25 + $0x18] sm:$0xff]  }
  0x13   : > { %275 = vst.msk [vmem:[#allocation2 + $0x50] sm:$0xff] %vm264_vm2, %v2123_v6  ;;  %276 = vst.msk [vmem:[#allocation2 + $0x58] sm:$0xff] %vm264_vm2, %v2123_v6  ;;  %1968 = vmatprep.subr.bf16.mxu0 %v2179_v5  ;;  %2035 = vmatprep.subr.bf16.mxu1 %v2179_v5  ;;  %v2071_v12 = vld [vmem:[%s2327_s25 + $0x90] sm:$0xff]   ;;  %v2073_v14 = vld [vmem:[%s2327_s25 + $0x98] sm:$0xff]  }
  0x14   : > { %277 = vst.msk [vmem:[#allocation2 + $0x60] sm:$0xff] %vm264_vm2, %v2123_v6  ;;  %278 = vst.msk [vmem:[#allocation2 + $0x68] sm:$0xff] %vm264_vm2, %v2123_v6  ;;  %1970 = vmatprep.mubr.msk.bf16.mxu0 %vm632_vm3, %v2066_v7  ;;  %2002 = vmatprep.mubr.msk.bf16.mxu1 %vm632_vm3, %v2067_v8  ;;  %v2074_v15 = vld [vmem:[%s2327_s25 + $0x20] sm:$0xff]   ;;  %v2076_v17 = vld [vmem:[%s2327_s25 + $0x28] sm:$0xff]  }
  0x15   : > { %279 = vst.msk [vmem:[#allocation2 + $0x70] sm:$0xff] %vm264_vm2, %v2123_v6  ;;  %280 = vst.msk [vmem:[#allocation2 + $0x78] sm:$0xff] %vm264_vm2, %v2123_v6  ;;  %v2075_v16 = vld [vmem:[%s2327_s25 + $0xa0] sm:$0xff]   ;;  %v2077_v18 = vld [vmem:[%s2327_s25 + $0xa8] sm:$0xff]  }
  0x16   : > { %281 = vst.msk [vmem:[#allocation2 + $0x80] sm:$0xff] %vm264_vm2, %v2123_v6  ;;  %282 = vst.msk [vmem:[#allocation2 + $0x88] sm:$0xff] %vm264_vm2, %v2123_v6  ;;  %1969 = vmatpush3.bf16.msra.mxu0 %v2179_v5  ;;  %2037 = vmatpush3.bf16.msra.mxu1 %v2179_v5  ;;  %v2078_v19 = vld [vmem:[%s2327_s25 + $0x30] sm:$0xff]   ;;  %v2080_v21 = vld [vmem:[%s2327_s25 + $0x38] sm:$0xff]  }
  0x17   : > { %283 = vst.msk [vmem:[#allocation2 + $0x90] sm:$0xff] %vm264_vm2, %v2123_v6  ;;  %284 = vst.msk [vmem:[#allocation2 + $0x98] sm:$0xff] %vm264_vm2, %v2123_v6  ;;  %v2079_v20 = vld [vmem:[%s2327_s25 + $0xb0] sm:$0xff]   ;;  %v2081_v22 = vld [vmem:[%s2327_s25 + $0xb8] sm:$0xff]  }
  0x18   : > { %285 = vst.msk [vmem:[#allocation2 + $0xa0] sm:$0xff] %vm264_vm2, %v2123_v6  ;;  %286 = vst.msk [vmem:[#allocation2 + $0xa8] sm:$0xff] %vm264_vm2, %v2123_v6  ;;  %v2082_v23 = vld [vmem:[%s2327_s25 + $0x40] sm:$0xff]   ;;  %v2084_v25 = vld [vmem:[%s2327_s25 + $0x48] sm:$0xff]  }
  0x19   : > { %287 = vst.msk [vmem:[#allocation2 + $0xb0] sm:$0xff] %vm264_vm2, %v2123_v6  ;;  %288 = vst.msk [vmem:[#allocation2 + $0xb8] sm:$0xff] %vm264_vm2, %v2123_v6  ;;  %1971 = vmatmul.mubr.msk.bf16.vlgmr.msra.gmra.mxu0 %vm632_vm3, %v2068_v9  ;;  %2003 = vmatmul.mubr.msk.bf16.vlgmr.msra.gmra.mxu1 %vm632_vm3, %v2069_v10  ;;  %v2083_v24 = vld [vmem:[%s2327_s25 + $0xc0] sm:$0xff]   ;;  %v2085_v26 = vld [vmem:[%s2327_s25 + $0xc8] sm:$0xff]  }
  0x1a   : > { %289 = vst.msk [vmem:[#allocation2 + $0xc0] sm:$0xff] %vm264_vm2, %v2123_v6  ;;  %290 = vst.msk [vmem:[#allocation2 + $0xc8] sm:$0xff] %vm264_vm2, %v2123_v6  ;;  %1974 = vmatprep.mubr.msk.bf16.mxu0 %vm632_vm3, %v2070_v11  ;;  %2006 = vmatprep.mubr.msk.bf16.mxu1 %vm632_vm3, %v2071_v12  ;;  %v2086_v27 = vld [vmem:[%s2327_s25 + $0x50] sm:$0xff]   ;;  %v2088_v29 = vld [vmem:[%s2327_s25 + $0x58] sm:$0xff]  }
  0x1b   : > { %291 = vst.msk [vmem:[#allocation2 + $0xd0] sm:$0xff] %vm264_vm2, %v2123_v6  ;;  %292 = vst.msk [vmem:[#allocation2 + $0xd8] sm:$0xff] %vm264_vm2, %v2123_v6  ;;  %v2087_v28 = vld [vmem:[%s2327_s25 + $0xd0] sm:$0xff]   ;;  %v2089_v30 = vld [vmem:[%s2327_s25 + $0xd8] sm:$0xff]  }
  0x1c   : > { %293 = vst.msk [vmem:[#allocation2 + $0xe0] sm:$0xff] %vm264_vm2, %v2123_v6  ;;  %294 = vst.msk [vmem:[#allocation2 + $0xe8] sm:$0xff] %vm264_vm2, %v2123_v6  ;;  %v2090_v31 = vld [vmem:[%s2327_s25 + $0x60] sm:$0xff]   ;;  %v2092_v33 = vld [vmem:[%s2327_s25 + $0x68] sm:$0xff]  }
  0x1d   : > { %295 = vst.msk [vmem:[#allocation2 + $0xf0] sm:$0xff] %vm264_vm2, %v2123_v6  ;;  %296 = vst.msk [vmem:[#allocation2 + $0xf8] sm:$0xff] %vm264_vm2, %v2123_v6  ;;  %v2091_v32 = vld [vmem:[%s2327_s25 + $0xe0] sm:$0xff]   ;;  %v2093_v34 = vld [vmem:[%s2327_s25 + $0xe8] sm:$0xff]  }
  0x1e   : > { %297 = vst.msk [vmem:[#allocation2 + $0x100] sm:$0xff] %vm264_vm2, %v2123_v6  ;;  %298 = vst.msk [vmem:[#allocation2 + $0x108] sm:$0xff] %vm264_vm2, %v2123_v6  ;;  %v2094_v35 = vld [vmem:[%s2327_s25 + $0x70] sm:$0xff]   ;;  %v2096_v37 = vld [vmem:[%s2327_s25 + $0x78] sm:$0xff]  }
  0x1f   : > { %299 = vst.msk [vmem:[#allocation2 + $0x110] sm:$0xff] %vm264_vm2, %v2123_v6  ;;  %300 = vst.msk [vmem:[#allocation2 + $0x118] sm:$0xff] %vm264_vm2, %v2123_v6  ;;  %v2095_v36 = vld [vmem:[%s2327_s25 + $0xf0] sm:$0xff]   ;;  %v2097_v38 = vld [vmem:[%s2327_s25 + $0xf8] sm:$0xff]  }
  0x20   : > { %301 = vst.msk [vmem:[#allocation2 + $0x120] sm:$0xff] %vm264_vm2, %v2123_v6  ;;  %302 = vst.msk [vmem:[#allocation2 + $0x128] sm:$0xff] %vm264_vm2, %v2123_v6  ;;  %v331_v39 = vld [vmem:[#allocation2 + $0x10] sm:$0xff]  ;;  %v329_v43 = vld [vmem:[#allocation2] sm:$0xff] }
  0x21   : > { %303 = vst.msk [vmem:[#allocation2 + $0x130] sm:$0xff] %vm264_vm2, %v2123_v6  ;;  %304 = vst.msk [vmem:[#allocation2 + $0x138] sm:$0xff] %vm264_vm2, %v2123_v6  ;;  %1975 = vmatmul.mubr.msk.bf16.gmra.mxu0 %vm632_vm3, %v2072_v13  ;;  %2007 = vmatmul.mubr.msk.bf16.gmra.mxu1 %vm632_vm3, %v2073_v14  ;;  %v332_v49 = vld [vmem:[#allocation2 + $0x18] sm:$0xff]  ;;  %v330_v55 = vld [vmem:[#allocation2 + $0x8] sm:$0xff] }
  0x22   : > { %305 = vst.msk [vmem:[#allocation2 + $0x140] sm:$0xff] %vm264_vm2, %v2123_v6  ;;  %306 = vst.msk [vmem:[#allocation2 + $0x148] sm:$0xff] %vm264_vm2, %v2123_v6  ;;  %1978 = vmatprep.mubr.msk.bf16.mxu0 %vm632_vm3, %v2074_v15  ;;  %2010 = vmatprep.mubr.msk.bf16.mxu1 %vm632_vm3, %v2075_v16  ;;  %v335_v61 = vld [vmem:[#allocation2 + $0x30] sm:$0xff]  ;;  %v333_v4 = vld [vmem:[#allocation2 + $0x20] sm:$0xff] }
  0x23   : > { %307 = vst.msk [vmem:[#allocation2 + $0x150] sm:$0xff] %vm264_vm2, %v2123_v6  ;;  %308 = vst.msk [vmem:[#allocation2 + $0x158] sm:$0xff] %vm264_vm2, %v2123_v6  ;;  %v336_v16 = vld [vmem:[#allocation2 + $0x38] sm:$0xff] }
  0x24   : > { %309 = vst.msk [vmem:[#allocation2 + $0x160] sm:$0xff] %vm264_vm2, %v2123_v6  ;;  %310 = vst.msk [vmem:[#allocation2 + $0x168] sm:$0xff] %vm264_vm2, %v2123_v6 }
  0x25   : > { %311 = vst.msk [vmem:[#allocation2 + $0x170] sm:$0xff] %vm264_vm2, %v2123_v6  ;;  %312 = vst.msk [vmem:[#allocation2 + $0x178] sm:$0xff] %vm264_vm2, %v2123_v6  ;;  %v361_v44 = vld [vmem:[#allocation2 + $0x100] sm:$0xff]  ;;  %v362_v56 = vld [vmem:[#allocation2 + $0x108] sm:$0xff] }
  0x26   : > { %313 = vst.msk [vmem:[#allocation2 + $0x180] sm:$0xff] %vm264_vm2, %v2123_v6  ;;  %314 = vst.msk [vmem:[#allocation2 + $0x188] sm:$0xff] %vm264_vm2, %v2123_v6  ;;  %v363_v40 = vld [vmem:[#allocation2 + $0x110] sm:$0xff]  ;;  %v364_v50 = vld [vmem:[#allocation2 + $0x118] sm:$0xff] }
  0x27   : > { %315 = vst.msk [vmem:[#allocation2 + $0x190] sm:$0xff] %vm264_vm2, %v2123_v6  ;;  %316 = vst.msk [vmem:[#allocation2 + $0x198] sm:$0xff] %vm264_vm2, %v2123_v6  ;;  %v365_v5 = vld [vmem:[#allocation2 + $0x120] sm:$0xff] }
  0x28   : > { %317 = vst.msk [vmem:[#allocation2 + $0x1a0] sm:$0xff] %vm264_vm2, %v2123_v6  ;;  %318 = vst.msk [vmem:[#allocation2 + $0x1a8] sm:$0xff] %vm264_vm2, %v2123_v6  ;;  %v367_v62 = vld [vmem:[#allocation2 + $0x130] sm:$0xff] }
  0x29   : > { %319 = vst.msk [vmem:[#allocation2 + $0x1b0] sm:$0xff] %vm264_vm2, %v2123_v6  ;;  %320 = vst.msk [vmem:[#allocation2 + $0x1b8] sm:$0xff] %vm264_vm2, %v2123_v6  ;;  %1979 = vmatmul.mubr.msk.bf16.gmra.mxu0 %vm632_vm3, %v2076_v17  ;;  %2011 = vmatmul.mubr.msk.bf16.gmra.mxu1 %vm632_vm3, %v2077_v18  ;;  %v368_v17 = vld [vmem:[#allocation2 + $0x138] sm:$0xff] }
  0x2a   : > { %321 = vst.msk [vmem:[#allocation2 + $0x1c0] sm:$0xff] %vm264_vm2, %v2123_v6  ;;  %322 = vst.msk [vmem:[#allocation2 + $0x1c8] sm:$0xff] %vm264_vm2, %v2123_v6  ;;  %1982 = vmatprep.mubr.msk.bf16.mxu0 %vm632_vm3, %v2078_v19  ;;  %2014 = vmatprep.mubr.msk.bf16.mxu1 %vm632_vm3, %v2079_v20 }
  0x2b   : > { %323 = vst.msk [vmem:[#allocation2 + $0x1d0] sm:$0xff] %vm264_vm2, %v2123_v6  ;;  %324 = vst.msk [vmem:[#allocation2 + $0x1d8] sm:$0xff] %vm264_vm2, %v2123_v6 }
  0x2c   : > { %325 = vst.msk [vmem:[#allocation2 + $0x1e0] sm:$0xff] %vm264_vm2, %v2123_v6  ;;  %326 = vst.msk [vmem:[#allocation2 + $0x1e8] sm:$0xff] %vm264_vm2, %v2123_v6 }
  0x2d   : > { %327 = vst.msk [vmem:[#allocation2 + $0x1f0] sm:$0xff] %vm264_vm2, %v2123_v6  ;;  %328 = vst.msk [vmem:[#allocation2 + $0x1f8] sm:$0xff] %vm264_vm2, %v2123_v6 }
  0x31   : > { %1983 = vmatmul.mubr.msk.bf16.gmra.mxu0 %vm632_vm3, %v2080_v21  ;;  %2015 = vmatmul.mubr.msk.bf16.gmra.mxu1 %vm632_vm3, %v2081_v22 }
  0x32   : > { %1986 = vmatprep.mubr.msk.bf16.mxu0 %vm632_vm3, %v2082_v23  ;;  %2018 = vmatprep.mubr.msk.bf16.mxu1 %vm632_vm3, %v2083_v24 }
  0x39   : > { %1987 = vmatmul.mubr.msk.bf16.gmra.mxu0 %vm632_vm3, %v2084_v25  ;;  %2019 = vmatmul.mubr.msk.bf16.gmra.mxu1 %vm632_vm3, %v2085_v26  ;;  %v334_v26 = vld [vmem:[#allocation2 + $0x28] sm:$0xff] }
  0x3a   : > { %1990 = vmatprep.mubr.msk.bf16.mxu0 %vm632_vm3, %v2086_v27  ;;  %2022 = vmatprep.mubr.msk.bf16.mxu1 %vm632_vm3, %v2087_v28  ;;  %v366_v27 = vld [vmem:[#allocation2 + $0x128] sm:$0xff] }
  0x41   : > { %1991 = vmatmul.mubr.msk.bf16.gmra.mxu0 %vm632_vm3, %v2088_v29  ;;  %2023 = vmatmul.mubr.msk.bf16.gmra.mxu1 %vm632_vm3, %v2089_v30 }
  0x42   : > { %1994 = vmatprep.mubr.msk.bf16.mxu0 %vm632_vm3, %v2090_v31  ;;  %2026 = vmatprep.mubr.msk.bf16.mxu1 %vm632_vm3, %v2091_v32 }
  0x49   : > { %1995 = vmatmul.mubr.msk.bf16.gmra.mxu0 %vm632_vm3, %v2092_v33  ;;  %2027 = vmatmul.mubr.msk.bf16.gmra.mxu1 %vm632_vm3, %v2093_v34 }
  0x4a   : > { %1998 = vmatprep.mubr.msk.bf16.mxu0 %vm632_vm3, %v2094_v35  ;;  %2030 = vmatprep.mubr.msk.bf16.mxu1 %vm632_vm3, %v2095_v36 }
  0x51   : > { %1999 = vmatmul.mubr.msk.bf16.gmra.mxu0 %vm632_vm3, %v2096_v37  ;;  %2031 = vmatmul.mubr.msk.bf16.gmra.mxu1 %vm632_vm3, %v2097_v38  ;;  %v339_v38 = vld [vmem:[#allocation2 + $0x50] sm:$0xff] }
  0xd9   : > { %v1972_v41 = vpop.f32.mrf.mxu0  ;;  %v2004_v42 = vpop.f32.mrf.mxu1 }
  0xda   : > { %v1027_v45 = vadd.f32 %v1972_v41, %v331_v39  ;;  %v1059_v46 = vadd.f32 %v2004_v42, %v363_v40  ;;  %v371_v39 = vld [vmem:[#allocation2 + $0x150] sm:$0xff] }
  0xdb   : > { %v770_v47 = vpop.f32.mrf.mxu0  ;;  %v898_v48 = vpop.f32.mrf.mxu1 }
  0xdc   : > { %1092 = vst.msk [vmem:[#allocation2 + $0x10] sm:$0xff] %vm264_vm2, %v1027_v45  ;;  %1124 = vst.msk [vmem:[#allocation2 + $0x110] sm:$0xff] %vm264_vm2, %v1059_v46  ;;  %v1025_v51 = vadd.f32 %v770_v47, %v329_v43  ;;  %v1057_v52 = vadd.f32 %v898_v48, %v361_v44 }
  0xdd   : > { %v1973_v53 = vpop.f32.mrf.mxu0  ;;  %v2005_v54 = vpop.f32.mrf.mxu1 }
  0xde   : > { %1090 = vst.msk [vmem:[#allocation2] sm:$0xff] %vm264_vm2, %v1025_v51  ;;  %1122 = vst.msk [vmem:[#allocation2 + $0x100] sm:$0xff] %vm264_vm2, %v1057_v52  ;;  %v1028_v57 = vadd.f32 %v1973_v53, %v332_v49  ;;  %v1060_v58 = vadd.f32 %v2005_v54, %v364_v50  ;;  %v337_v50 = vld [vmem:[#allocation2 + $0x40] sm:$0xff] }
  0xdf   : > { %v773_v59 = vpop.f32.mrf.mxu0  ;;  %v901_v60 = vpop.f32.mrf.mxu1  ;;  %v369_v51 = vld [vmem:[#allocation2 + $0x140] sm:$0xff] }
  0xe0   : > { %1093 = vst.msk [vmem:[#allocation2 + $0x18] sm:$0xff] %vm264_vm2, %v1028_v57  ;;  %1125 = vst.msk [vmem:[#allocation2 + $0x118] sm:$0xff] %vm264_vm2, %v1060_v58  ;;  %v1026_v63 = vadd.f32 %v773_v59, %v330_v55  ;;  %v1058_v0 = vadd.f32 %v901_v60, %v362_v56 }
  0xe1   : > { %v1976_v2 = vpop.f32.mrf.mxu0  ;;  %v2008_v3 = vpop.f32.mrf.mxu1 }
  0xe2   : > { %1091 = vst.msk [vmem:[#allocation2 + $0x8] sm:$0xff] %vm264_vm2, %v1026_v63  ;;  %1123 = vst.msk [vmem:[#allocation2 + $0x108] sm:$0xff] %vm264_vm2, %v1058_v0  ;;  %v1031_v6 = vadd.f32 %v1976_v2, %v335_v61  ;;  %v1063_v7 = vadd.f32 %v2008_v3, %v367_v62  ;;  %v340_v62 = vld [vmem:[#allocation2 + $0x58] sm:$0xff]  ;;  %v338_v0 = vld [vmem:[#allocation2 + $0x48] sm:$0xff] }
  0xe3   : > { %v1159_v8 = vld [vmem:[#allocation2 + $0x10] sm:$0xff]  ;;  %v786_v10 = vpop.f32.mrf.mxu0  ;;  %v914_v11 = vpop.f32.mrf.mxu1  ;;  %v372_v63 = vld [vmem:[#allocation2 + $0x158] sm:$0xff] }
  0xe4   : > { %v1191_v9 = vld [vmem:[#allocation2 + $0x110] sm:$0xff]  ;;  %v1230_v12 = vadd.f32 %v2404_v1, %v1159_v8  ;;  %1096 = vst.msk [vmem:[#allocation2 + $0x30] sm:$0xff] %vm264_vm2, %v1031_v6  ;;  %1128 = vst.msk [vmem:[#allocation2 + $0x130] sm:$0xff] %vm264_vm2, %v1063_v7  ;;  %v1029_v14 = vadd.f32 %v786_v10, %v333_v4  ;;  %v1061_v15 = vadd.f32 %v914_v11, %v365_v5  ;;  %v370_v8 = vld [vmem:[#allocation2 + $0x148] sm:$0xff] }
  0xe5   : > { %v1262_v13 = vadd.f32 %v2404_v1, %v1191_v9  ;;  %v1157_v18 = vld [vmem:[#allocation2] sm:$0xff]  ;;  %v1977_v20 = vpop.f32.mrf.mxu0  ;;  %v2009_v21 = vpop.f32.mrf.mxu1 }
  0xe6   : > { %v1189_v19 = vld [vmem:[#allocation2 + $0x100] sm:$0xff]  ;;  %v1870_v22 = vpack.c.bf16 %v1230_v12, %v1230_v12  ;;  %v1228_v24 = vadd.f32 %v2404_v1, %v1157_v18  ;;  %1094 = vst.msk [vmem:[#allocation2 + $0x20] sm:$0xff] %vm264_vm2, %v1029_v14  ;;  %1126 = vst.msk [vmem:[#allocation2 + $0x120] sm:$0xff] %vm264_vm2, %v1061_v15  ;;  %v1032_v30 = vadd.f32 %v1977_v20, %v336_v16  ;;  %v375_v18 = vld [vmem:[#allocation2 + $0x170] sm:$0xff] }
  0xe7   : > { %v1902_v23 = vpack.c.bf16 %v1262_v13, %v1262_v13  ;;  %v1260_v25 = vadd.f32 %v2404_v1, %v1189_v19  ;;  %v1160_v28 = vld [vmem:[#allocation2 + $0x18] sm:$0xff]  ;;  %v1064_v31 = vadd.f32 %v2009_v21, %v368_v17  ;;  %v789_v32 = vpop.f32.mrf.mxu0  ;;  %v917_v33 = vpop.f32.mrf.mxu1  ;;  %v343_v17 = vld [vmem:[#allocation2 + $0x70] sm:$0xff] }
  0xe8   : > { %v1192_v29 = vld [vmem:[#allocation2 + $0x118] sm:$0xff]  ;;  %1551 = vst.msk [vmem:[%s2417_s30 + $0x8] sm:$0xf] %vm1548_vm4, %v1870_v22  ;;  %v1868_v34 = vpack.c.bf16 %v1228_v24, %v1228_v24  ;;  %v1231_v36 = vadd.f32 %v2404_v1, %v1160_v28  ;;  %v1030_v42 = vadd.f32 %v789_v32, %v334_v26  ;;  %v1062_v43 = vadd.f32 %v917_v33, %v366_v27 }
  0xe9   : > { %1583 = vst.msk [vmem:[%s2417_s30 + $0x88] sm:$0xf] %vm1548_vm4, %v1902_v23  ;;  %v1900_v35 = vpack.c.bf16 %v1260_v25, %v1260_v25  ;;  %v1263_v37 = vadd.f32 %v2404_v1, %v1192_v29  ;;  %v1158_v40 = vld [vmem:[#allocation2 + $0x8] sm:$0xff]  ;;  %v1980_v44 = vpop.f32.mrf.mxu0  ;;  %v2012_v45 = vpop.f32.mrf.mxu1  ;;  %v341_v29 = vld [vmem:[#allocation2 + $0x60] sm:$0xff] }
  0xea   : > { %v1190_v41 = vld [vmem:[#allocation2 + $0x108] sm:$0xff]  ;;  %1097 = vst.msk [vmem:[#allocation2 + $0x38] sm:$0xff] %vm264_vm2, %v1032_v30  ;;  %1129 = vst.msk [vmem:[#allocation2 + $0x138] sm:$0xff] %vm264_vm2, %v1064_v31  ;;  %v1871_v46 = vpack.c.bf16 %v1231_v36, %v1231_v36  ;;  %v1229_v48 = vadd.f32 %v2404_v1, %v1158_v40  ;;  %v1035_v54 = vadd.f32 %v1980_v44, %v339_v38  ;;  %v373_v30 = vld [vmem:[#allocation2 + $0x160] sm:$0xff] }
  0xeb   : > { %1549 = vst.msk [vmem:[%s2417_s30] sm:$0xf] %vm1548_vm4, %v1868_v34  ;;  %1581 = vst.msk [vmem:[%s2417_s30 + $0x80] sm:$0xf] %vm1548_vm4, %v1900_v35  ;;  %v1903_v47 = vpack.c.bf16 %v1263_v37, %v1263_v37  ;;  %v1261_v49 = vadd.f32 %v2404_v1, %v1190_v41  ;;  %v1163_v52 = vld [vmem:[#allocation2 + $0x30] sm:$0xff]  ;;  %v1067_v55 = vadd.f32 %v2012_v45, %v371_v39  ;;  %v802_v56 = vpop.f32.mrf.mxu0  ;;  %v930_v57 = vpop.f32.mrf.mxu1  ;;  %v344_v41 = vld [vmem:[#allocation2 + $0x78] sm:$0xff] }
  0xec   : > { %v1195_v53 = vld [vmem:[#allocation2 + $0x130] sm:$0xff]  ;;  %1095 = vst.msk [vmem:[#allocation2 + $0x28] sm:$0xff] %vm264_vm2, %v1030_v42  ;;  %1127 = vst.msk [vmem:[#allocation2 + $0x128] sm:$0xff] %vm264_vm2, %v1062_v43  ;;  %v1869_v58 = vpack.c.bf16 %v1229_v48, %v1229_v48  ;;  %v1234_v60 = vadd.f32 %v2404_v1, %v1163_v52  ;;  %v1033_v4 = vadd.f32 %v802_v56, %v337_v50  ;;  %v376_v42 = vld [vmem:[#allocation2 + $0x178] sm:$0xff] }
  0xed   : > { %1552 = vst.msk [vmem:[%s2417_s30 + $0xc] sm:$0xf] %vm1548_vm4, %v1871_v46  ;;  %1584 = vst.msk [vmem:[%s2417_s30 + $0x8c] sm:$0xf] %vm1548_vm4, %v1903_v47  ;;  %v1901_v59 = vpack.c.bf16 %v1261_v49, %v1261_v49  ;;  %v1266_v61 = vadd.f32 %v2404_v1, %v1195_v53  ;;  %v1161_v2 = vld [vmem:[#allocation2 + $0x20] sm:$0xff]  ;;  %v1065_v5 = vadd.f32 %v930_v57, %v369_v51  ;;  %v1981_v6 = vpop.f32.mrf.mxu0  ;;  %v2013_v7 = vpop.f32.mrf.mxu1  ;;  %v342_v53 = vld [vmem:[#allocation2 + $0x68] sm:$0xff] }
  0xee   : > { %v1193_v3 = vld [vmem:[#allocation2 + $0x120] sm:$0xff]  ;;  %1100 = vst.msk [vmem:[#allocation2 + $0x50] sm:$0xff] %vm264_vm2, %v1035_v54  ;;  %1132 = vst.msk [vmem:[#allocation2 + $0x150] sm:$0xff] %vm264_vm2, %v1067_v55  ;;  %v1874_v9 = vpack.c.bf16 %v1234_v60, %v1234_v60  ;;  %v1232_v11 = vadd.f32 %v2404_v1, %v1161_v2  ;;  %v1036_v13 = vadd.f32 %v1981_v6, %v340_v62  ;;  %v374_v54 = vld [vmem:[#allocation2 + $0x168] sm:$0xff] }
  0xef   : > { %1550 = vst.msk [vmem:[%s2417_s30 + $0x4] sm:$0xf] %vm1548_vm4, %v1869_v58  ;;  %1582 = vst.msk [vmem:[%s2417_s30 + $0x84] sm:$0xf] %vm1548_vm4, %v1901_v59  ;;  %v1906_v10 = vpack.c.bf16 %v1266_v61, %v1266_v61  ;;  %v1264_v12 = vadd.f32 %v2404_v1, %v1193_v3  ;;  %v1068_v14 = vadd.f32 %v2013_v7, %v372_v63  ;;  %v805_v15 = vpop.f32.mrf.mxu0  ;;  %v933_v16 = vpop.f32.mrf.mxu1  ;;  %v347_v2 = vld [vmem:[#allocation2 + $0x90] sm:$0xff] }
  0xf0   : > { %1098 = vst.msk [vmem:[#allocation2 + $0x40] sm:$0xff] %vm264_vm2, %v1033_v4  ;;  %1130 = vst.msk [vmem:[#allocation2 + $0x140] sm:$0xff] %vm264_vm2, %v1065_v5  ;;  %v1872_v19 = vpack.c.bf16 %v1232_v11, %v1232_v11  ;;  %v1034_v23 = vadd.f32 %v805_v15, %v338_v0  ;;  %v1066_v24 = vadd.f32 %v933_v16, %v370_v8  ;;  %v379_v3 = vld [vmem:[#allocation2 + $0x190] sm:$0xff] }
  0xf1   : > { %1555 = vst.msk [vmem:[%s2417_s30 + $0x18] sm:$0xf] %vm1548_vm4, %v1874_v9  ;;  %1587 = vst.msk [vmem:[%s2417_s30 + $0x98] sm:$0xf] %vm1548_vm4, %v1906_v10  ;;  %v1904_v20 = vpack.c.bf16 %v1264_v12, %v1264_v12  ;;  %v1164_v21 = vld [vmem:[#allocation2 + $0x38] sm:$0xff]  ;;  %v1984_v27 = vpop.f32.mrf.mxu0  ;;  %v2016_v28 = vpop.f32.mrf.mxu1 }
  0xf2   : > { %v1196_v22 = vld [vmem:[#allocation2 + $0x138] sm:$0xff]  ;;  %v1235_v25 = vadd.f32 %v2404_v1, %v1164_v21  ;;  %1101 = vst.msk [vmem:[#allocation2 + $0x58] sm:$0xff] %vm264_vm2, %v1036_v13  ;;  %1133 = vst.msk [vmem:[#allocation2 + $0x158] sm:$0xff] %vm264_vm2, %v1068_v14  ;;  %v1039_v33 = vadd.f32 %v1984_v27, %v343_v17  ;;  %v1071_v34 = vadd.f32 %v2016_v28, %v375_v18  ;;  %v377_v21 = vld [vmem:[#allocation2 + $0x180] sm:$0xff] }
  0xf3   : > { %v1267_v26 = vadd.f32 %v2404_v1, %v1196_v22  ;;  %1553 = vst.msk [vmem:[%s2417_s30 + $0x10] sm:$0xf] %vm1548_vm4, %v1872_v19  ;;  %1585 = vst.msk [vmem:[%s2417_s30 + $0x90] sm:$0xf] %vm1548_vm4, %v1904_v20  ;;  %v1162_v31 = vld [vmem:[#allocation2 + $0x28] sm:$0xff]  ;;  %v818_v39 = vpop.f32.mrf.mxu0  ;;  %v946_v40 = vpop.f32.mrf.mxu1  ;;  %v345_v20 = vld [vmem:[#allocation2 + $0x80] sm:$0xff] }
  0xf4   : > { %v1194_v32 = vld [vmem:[#allocation2 + $0x128] sm:$0xff]  ;;  %1099 = vst.msk [vmem:[#allocation2 + $0x48] sm:$0xff] %vm264_vm2, %v1034_v23  ;;  %1131 = vst.msk [vmem:[#allocation2 + $0x148] sm:$0xff] %vm264_vm2, %v1066_v24  ;;  %v1875_v35 = vpack.c.bf16 %v1235_v25, %v1235_v25  ;;  %v1233_v37 = vadd.f32 %v2404_v1, %v1162_v31  ;;  %v1037_v45 = vadd.f32 %v818_v39, %v341_v29 }
  0xf5   : > { %v1907_v36 = vpack.c.bf16 %v1267_v26, %v1267_v26  ;;  %v1265_v38 = vadd.f32 %v2404_v1, %v1194_v32  ;;  %v1167_v43 = vld [vmem:[#allocation2 + $0x50] sm:$0xff]  ;;  %1104 = vst.msk [vmem:[#allocation2 + $0x70] sm:$0xff] %vm264_vm2, %v1039_v33  ;;  %1136 = vst.msk [vmem:[#allocation2 + $0x170] sm:$0xff] %vm264_vm2, %v1071_v34  ;;  %v1069_v46 = vadd.f32 %v946_v40, %v373_v30  ;;  %v1985_v51 = vpop.f32.mrf.mxu0  ;;  %v2017_v52 = vpop.f32.mrf.mxu1  ;;  %v348_v32 = vld [vmem:[#allocation2 + $0x98] sm:$0xff] }
  0xf6   : > { %v1199_v44 = vld [vmem:[#allocation2 + $0x150] sm:$0xff]  ;;  %1556 = vst.msk [vmem:[%s2417_s30 + $0x1c] sm:$0xf] %vm1548_vm4, %v1875_v35  ;;  %v1873_v47 = vpack.c.bf16 %v1233_v37, %v1233_v37  ;;  %v1238_v49 = vadd.f32 %v2404_v1, %v1167_v43  ;;  %v1040_v57 = vadd.f32 %v1985_v51, %v344_v41  ;;  %v1072_v58 = vadd.f32 %v2017_v52, %v376_v42  ;;  %v380_v33 = vld [vmem:[#allocation2 + $0x198] sm:$0xff] }
  0xf7   : > { %1588 = vst.msk [vmem:[%s2417_s30 + $0x9c] sm:$0xf] %vm1548_vm4, %v1907_v36  ;;  %v1905_v48 = vpack.c.bf16 %v1265_v38, %v1265_v38  ;;  %v1270_v50 = vadd.f32 %v2404_v1, %v1199_v44  ;;  %v1165_v55 = vld [vmem:[#allocation2 + $0x40] sm:$0xff]  ;;  %v821_v63 = vpop.f32.mrf.mxu0  ;;  %v949_v0 = vpop.f32.mrf.mxu1  ;;  %v346_v44 = vld [vmem:[#allocation2 + $0x88] sm:$0xff] }
  0xf8   : > { %v1197_v56 = vld [vmem:[#allocation2 + $0x140] sm:$0xff]  ;;  %1102 = vst.msk [vmem:[#allocation2 + $0x60] sm:$0xff] %vm264_vm2, %v1037_v45  ;;  %1134 = vst.msk [vmem:[#allocation2 + $0x160] sm:$0xff] %vm264_vm2, %v1069_v46  ;;  %v1878_v59 = vpack.c.bf16 %v1238_v49, %v1238_v49  ;;  %v1236_v61 = vadd.f32 %v2404_v1, %v1165_v55  ;;  %v1038_v6 = vadd.f32 %v821_v63, %v342_v53  ;;  %v378_v45 = vld [vmem:[#allocation2 + $0x188] sm:$0xff] }
  0xf9   : > { %1554 = vst.msk [vmem:[%s2417_s30 + $0x14] sm:$0xf] %vm1548_vm4, %v1873_v47  ;;  %1586 = vst.msk [vmem:[%s2417_s30 + $0x94] sm:$0xf] %vm1548_vm4, %v1905_v48  ;;  %v1910_v60 = vpack.c.bf16 %v1270_v50, %v1270_v50  ;;  %v1268_v62 = vadd.f32 %v2404_v1, %v1197_v56  ;;  %v1168_v4 = vld [vmem:[#allocation2 + $0x58] sm:$0xff]  ;;  %v1070_v7 = vadd.f32 %v949_v0, %v374_v54  ;;  %v1988_v14 = vpop.f32.mrf.mxu0  ;;  %v2020_v15 = vpop.f32.mrf.mxu1  ;;  %v351_v56 = vld [vmem:[#allocation2 + $0xb0] sm:$0xff] }
  0xfa   : > { %v1200_v5 = vld [vmem:[#allocation2 + $0x158] sm:$0xff]  ;;  %1105 = vst.msk [vmem:[#allocation2 + $0x78] sm:$0xff] %vm264_vm2, %v1040_v57  ;;  %1137 = vst.msk [vmem:[#allocation2 + $0x178] sm:$0xff] %vm264_vm2, %v1072_v58  ;;  %v1876_v8 = vpack.c.bf16 %v1236_v61, %v1236_v61  ;;  %v1239_v10 = vadd.f32 %v2404_v1, %v1168_v4  ;;  %v1043_v18 = vadd.f32 %v1988_v14, %v347_v2  ;;  %v383_v57 = vld [vmem:[#allocation2 + $0x1b0] sm:$0xff] }
  0xfb   : > { %1559 = vst.msk [vmem:[%s2417_s30 + $0x28] sm:$0xf] %vm1548_vm4, %v1878_v59  ;;  %1591 = vst.msk [vmem:[%s2417_s30 + $0xa8] sm:$0xf] %vm1548_vm4, %v1910_v60  ;;  %v1908_v9 = vpack.c.bf16 %v1268_v62, %v1268_v62  ;;  %v1271_v11 = vadd.f32 %v2404_v1, %v1200_v5  ;;  %v1166_v12 = vld [vmem:[#allocation2 + $0x48] sm:$0xff]  ;;  %v1075_v19 = vadd.f32 %v2020_v15, %v379_v3  ;;  %v834_v26 = vpop.f32.mrf.mxu0  ;;  %v962_v27 = vpop.f32.mrf.mxu1  ;;  %v349_v5 = vld [vmem:[#allocation2 + $0xa0] sm:$0xff] }
  0xfc   : > { %v1198_v13 = vld [vmem:[#allocation2 + $0x148] sm:$0xff]  ;;  %v1237_v16 = vadd.f32 %v2404_v1, %v1166_v12  ;;  %1103 = vst.msk [vmem:[#allocation2 + $0x68] sm:$0xff] %vm264_vm2, %v1038_v6  ;;  %1135 = vst.msk [vmem:[#allocation2 + $0x168] sm:$0xff] %vm264_vm2, %v1070_v7  ;;  %v1879_v22 = vpack.c.bf16 %v1239_v10, %v1239_v10  ;;  %v1171_v24 = vld [vmem:[#allocation2 + $0x70] sm:$0xff]  ;;  %v1041_v36 = vadd.f32 %v834_v26, %v345_v20 }
  0xfd   : > { %v1269_v17 = vadd.f32 %v2404_v1, %v1198_v13  ;;  %1557 = vst.msk [vmem:[%s2417_s30 + $0x20] sm:$0xf] %vm1548_vm4, %v1876_v8  ;;  %1589 = vst.msk [vmem:[%s2417_s30 + $0xa0] sm:$0xf] %vm1548_vm4, %v1908_v9  ;;  %v1911_v23 = vpack.c.bf16 %v1271_v11, %v1271_v11  ;;  %v1203_v25 = vld [vmem:[#allocation2 + $0x170] sm:$0xff]  ;;  %v1242_v30 = vadd.f32 %v2404_v1, %v1171_v24  ;;  %v1989_v38 = vpop.f32.mrf.mxu0  ;;  %v2021_v39 = vpop.f32.mrf.mxu1  ;;  %v381_v6 = vld [vmem:[#allocation2 + $0x1a0] sm:$0xff] }
  0xfe   : > { %v1877_v28 = vpack.c.bf16 %v1237_v16, %v1237_v16  ;;  %v1274_v31 = vadd.f32 %v2404_v1, %v1203_v25  ;;  %1108 = vst.msk [vmem:[#allocation2 + $0x90] sm:$0xff] %vm264_vm2, %v1043_v18  ;;  %1140 = vst.msk [vmem:[#allocation2 + $0x190] sm:$0xff] %vm264_vm2, %v1075_v19  ;;  %v1073_v37 = vadd.f32 %v962_v27, %v377_v21  ;;  %v352_v7 = vld [vmem:[#allocation2 + $0xb8] sm:$0xff]  ;;  %v382_v24 = vld [vmem:[#allocation2 + $0x1a8] sm:$0xff] }
  0xff   : > { %v1909_v29 = vpack.c.bf16 %v1269_v17, %v1269_v17  ;;  %1560 = vst.msk [vmem:[%s2417_s30 + $0x2c] sm:$0xf] %vm1548_vm4, %v1879_v22  ;;  %1592 = vst.msk [vmem:[%s2417_s30 + $0xac] sm:$0xf] %vm1548_vm4, %v1911_v23  ;;  %v1169_v34 = vld [vmem:[#allocation2 + $0x60] sm:$0xff]  ;;  %v1882_v40 = vpack.c.bf16 %v1242_v30, %v1242_v30  ;;  %v1044_v48 = vadd.f32 %v1989_v38, %v348_v32  ;;  %v837_v50 = vpop.f32.mrf.mxu0  ;;  %v965_v51 = vpop.f32.mrf.mxu1  ;;  %v384_v14 = vld [vmem:[#allocation2 + $0x1b8] sm:$0xff] }
 0x100   : > { %v1201_v35 = vld [vmem:[#allocation2 + $0x160] sm:$0xff]  ;;  %1558 = vst.msk [vmem:[%s2417_s30 + $0x24] sm:$0xf] %vm1548_vm4, %v1877_v28  ;;  %v1914_v41 = vpack.c.bf16 %v1274_v31, %v1274_v31  ;;  %v1240_v42 = vadd.f32 %v2404_v1, %v1169_v34  ;;  %v1076_v49 = vadd.f32 %v2021_v39, %v380_v33  ;;  %v1042_v60 = vadd.f32 %v837_v50, %v346_v44  ;;  %v350_v23 = vld [vmem:[#allocation2 + $0xa8] sm:$0xff] }
 0x101   : > { %1590 = vst.msk [vmem:[%s2417_s30 + $0xa4] sm:$0xf] %vm1548_vm4, %v1909_v29  ;;  %v1272_v43 = vadd.f32 %v2404_v1, %v1201_v35  ;;  %v1172_v46 = vld [vmem:[#allocation2 + $0x78] sm:$0xff]  ;;  %1563 = vst.msk [vmem:[%s2417_s30 + $0x38] sm:$0xf] %vm1548_vm4, %v1882_v40  ;;  %v1074_v61 = vadd.f32 %v965_v51, %v378_v45  ;;  %v1992_v62 = vpop.f32.mrf.mxu0  ;;  %v2024_v63 = vpop.f32.mrf.mxu1  ;;  %v355_v35 = vld [vmem:[#allocation2 + $0xd0] sm:$0xff] }
 0x102   : > { %v1204_v47 = vld [vmem:[#allocation2 + $0x178] sm:$0xff]  ;;  %1106 = vst.msk [vmem:[#allocation2 + $0x80] sm:$0xff] %vm264_vm2, %v1041_v36  ;;  %1138 = vst.msk [vmem:[#allocation2 + $0x180] sm:$0xff] %vm264_vm2, %v1073_v37  ;;  %v1880_v52 = vpack.c.bf16 %v1240_v42, %v1240_v42  ;;  %v1243_v54 = vadd.f32 %v2404_v1, %v1172_v46  ;;  %v1047_v10 = vadd.f32 %v1992_v62, %v351_v56  ;;  %v387_v36 = vld [vmem:[#allocation2 + $0x1d0] sm:$0xff] }
 0x103   : > { %1595 = vst.msk [vmem:[%s2417_s30 + $0xb8] sm:$0xf] %vm1548_vm4, %v1914_v41  ;;  %v1912_v53 = vpack.c.bf16 %v1272_v43, %v1272_v43  ;;  %v1275_v55 = vadd.f32 %v2404_v1, %v1204_v47  ;;  %v1170_v58 = vld [vmem:[#allocation2 + $0x68] sm:$0xff]  ;;  %v1079_v11 = vadd.f32 %v2024_v63, %v383_v57  ;;  %v850_v12 = vpop.f32.mrf.mxu0  ;;  %v978_v13 = vpop.f32.mrf.mxu1  ;;  %v353_v47 = vld [vmem:[#allocation2 + $0xc0] sm:$0xff] }
 0x104   : > { %v1202_v59 = vld [vmem:[#allocation2 + $0x168] sm:$0xff]  ;;  %1109 = vst.msk [vmem:[#allocation2 + $0x98] sm:$0xff] %vm264_vm2, %v1044_v48  ;;  %1141 = vst.msk [vmem:[#allocation2 + $0x198] sm:$0xff] %vm264_vm2, %v1076_v49  ;;  %v1883_v0 = vpack.c.bf16 %v1243_v54, %v1243_v54  ;;  %v1241_v3 = vadd.f32 %v2404_v1, %v1170_v58  ;;  %v1045_v19 = vadd.f32 %v850_v12, %v349_v5  ;;  %v385_v48 = vld [vmem:[#allocation2 + $0x1c0] sm:$0xff] }
 0x105   : > { %1561 = vst.msk [vmem:[%s2417_s30 + $0x30] sm:$0xf] %vm1548_vm4, %v1880_v52  ;;  %1593 = vst.msk [vmem:[%s2417_s30 + $0xb0] sm:$0xf] %vm1548_vm4, %v1912_v53  ;;  %v1915_v2 = vpack.c.bf16 %v1275_v55, %v1275_v55  ;;  %v1273_v4 = vadd.f32 %v2404_v1, %v1202_v59  ;;  %v1175_v8 = vld [vmem:[#allocation2 + $0x90] sm:$0xff]  ;;  %v1077_v20 = vadd.f32 %v978_v13, %v381_v6  ;;  %v1993_v21 = vpop.f32.mrf.mxu0  ;;  %v2025_v22 = vpop.f32.mrf.mxu1  ;;  %v356_v59 = vld [vmem:[#allocation2 + $0xd8] sm:$0xff] }
 0x106   : > { %v1207_v9 = vld [vmem:[#allocation2 + $0x190] sm:$0xff]  ;;  %1107 = vst.msk [vmem:[#allocation2 + $0x88] sm:$0xff] %vm264_vm2, %v1042_v60  ;;  %1139 = vst.msk [vmem:[#allocation2 + $0x188] sm:$0xff] %vm264_vm2, %v1074_v61  ;;  %v1881_v15 = vpack.c.bf16 %v1241_v3, %v1241_v3  ;;  %v1246_v17 = vadd.f32 %v2404_v1, %v1175_v8  ;;  %v1048_v29 = vadd.f32 %v1993_v21, %v352_v7  ;;  %v388_v60 = vld [vmem:[#allocation2 + $0x1d8] sm:$0xff] }
 0x107   : > { %1564 = vst.msk [vmem:[%s2417_s30 + $0x3c] sm:$0xf] %vm1548_vm4, %v1883_v0  ;;  %1596 = vst.msk [vmem:[%s2417_s30 + $0xbc] sm:$0xf] %vm1548_vm4, %v1915_v2  ;;  %v1913_v16 = vpack.c.bf16 %v1273_v4, %v1273_v4  ;;  %v1278_v18 = vadd.f32 %v2404_v1, %v1207_v9  ;;  %v1080_v30 = vadd.f32 %v2025_v22, %v384_v14  ;;  %v853_v33 = vpop.f32.mrf.mxu0  ;;  %v981_v34 = vpop.f32.mrf.mxu1  ;;  %v354_v8 = vld [vmem:[#allocation2 + $0xc8] sm:$0xff] }
 0x108   : > { %1112 = vst.msk [vmem:[#allocation2 + $0xb0] sm:$0xff] %vm264_vm2, %v1047_v10  ;;  %1144 = vst.msk [vmem:[#allocation2 + $0x1b0] sm:$0xff] %vm264_vm2, %v1079_v11  ;;  %v1886_v25 = vpack.c.bf16 %v1246_v17, %v1246_v17  ;;  %v1046_v39 = vadd.f32 %v853_v33, %v350_v23  ;;  %v1078_v40 = vadd.f32 %v981_v34, %v382_v24  ;;  %v386_v9 = vld [vmem:[#allocation2 + $0x1c8] sm:$0xff] }
 0x109   : > { %1562 = vst.msk [vmem:[%s2417_s30 + $0x34] sm:$0xf] %vm1548_vm4, %v1881_v15  ;;  %1594 = vst.msk [vmem:[%s2417_s30 + $0xb4] sm:$0xf] %vm1548_vm4, %v1913_v16  ;;  %v1918_v26 = vpack.c.bf16 %v1278_v18, %v1278_v18  ;;  %v1173_v27 = vld [vmem:[#allocation2 + $0x80] sm:$0xff]  ;;  %v1996_v45 = vpop.f32.mrf.mxu0  ;;  %v2028_v46 = vpop.f32.mrf.mxu1 }
 0x10a   : > { %v1205_v28 = vld [vmem:[#allocation2 + $0x180] sm:$0xff]  ;;  %v1244_v31 = vadd.f32 %v2404_v1, %v1173_v27  ;;  %1110 = vst.msk [vmem:[#allocation2 + $0xa0] sm:$0xff] %vm264_vm2, %v1045_v19  ;;  %1142 = vst.msk [vmem:[#allocation2 + $0x1a0] sm:$0xff] %vm264_vm2, %v1077_v20  ;;  %v1051_v51 = vadd.f32 %v1996_v45, %v355_v35  ;;  %v1083_v52 = vadd.f32 %v2028_v46, %v387_v36  ;;  %v391_v27 = vld [vmem:[#allocation2 + $0x1f0] sm:$0xff] }
 0x10b   : > { %v1276_v32 = vadd.f32 %v2404_v1, %v1205_v28  ;;  %1567 = vst.msk [vmem:[%s2417_s30 + $0x48] sm:$0xf] %vm1548_vm4, %v1886_v25  ;;  %1599 = vst.msk [vmem:[%s2417_s30 + $0xc8] sm:$0xf] %vm1548_vm4, %v1918_v26  ;;  %v1176_v37 = vld [vmem:[#allocation2 + $0x98] sm:$0xff]  ;;  %v866_v57 = vpop.f32.mrf.mxu0  ;;  %v994_v58 = vpop.f32.mrf.mxu1  ;;  %v359_v26 = vld [vmem:[#allocation2 + $0xf0] sm:$0xff] }
 0x10c   : > { %v1208_v38 = vld [vmem:[#allocation2 + $0x198] sm:$0xff]  ;;  %1113 = vst.msk [vmem:[#allocation2 + $0xb8] sm:$0xff] %vm264_vm2, %v1048_v29  ;;  %1145 = vst.msk [vmem:[#allocation2 + $0x1b8] sm:$0xff] %vm264_vm2, %v1080_v30  ;;  %v1884_v41 = vpack.c.bf16 %v1244_v31, %v1244_v31  ;;  %v1247_v43 = vadd.f32 %v2404_v1, %v1176_v37  ;;  %v1049_v63 = vadd.f32 %v866_v57, %v353_v47 }
 0x10d   : > { %v1916_v42 = vpack.c.bf16 %v1276_v32, %v1276_v32  ;;  %v1279_v44 = vadd.f32 %v2404_v1, %v1208_v38  ;;  %v1174_v49 = vld [vmem:[#allocation2 + $0x88] sm:$0xff]  ;;  %1111 = vst.msk [vmem:[#allocation2 + $0xa8] sm:$0xff] %vm264_vm2, %v1046_v39  ;;  %1143 = vst.msk [vmem:[#allocation2 + $0x1a8] sm:$0xff] %vm264_vm2, %v1078_v40  ;;  %v1081_v0 = vadd.f32 %v994_v58, %v385_v48  ;;  %v1997_v6 = vpop.f32.mrf.mxu0  ;;  %v2029_v7 = vpop.f32.mrf.mxu1  ;;  %v357_v38 = vld [vmem:[#allocation2 + $0xe0] sm:$0xff] }
 0x10e   : > { %v1206_v50 = vld [vmem:[#allocation2 + $0x188] sm:$0xff]  ;;  %1565 = vst.msk [vmem:[%s2417_s30 + $0x40] sm:$0xf] %vm1548_vm4, %v1884_v41  ;;  %v1887_v53 = vpack.c.bf16 %v1247_v43, %v1247_v43  ;;  %v1245_v55 = vadd.f32 %v2404_v1, %v1174_v49  ;;  %v1052_v12 = vadd.f32 %v1997_v6, %v356_v59  ;;  %v1084_v13 = vadd.f32 %v2029_v7, %v388_v60  ;;  %v389_v39 = vld [vmem:[#allocation2 + $0x1e0] sm:$0xff] }
 0x10f   : > { %1597 = vst.msk [vmem:[%s2417_s30 + $0xc0] sm:$0xf] %vm1548_vm4, %v1916_v42  ;;  %v1919_v54 = vpack.c.bf16 %v1279_v44, %v1279_v44  ;;  %v1277_v56 = vadd.f32 %v2404_v1, %v1206_v50  ;;  %v1179_v61 = vld [vmem:[#allocation2 + $0xb0] sm:$0xff]  ;;  %v869_v20 = vpop.f32.mrf.mxu0  ;;  %v997_v21 = vpop.f32.mrf.mxu1  ;;  %v360_v50 = vld [vmem:[#allocation2 + $0xf8] sm:$0xff] }
 0x110   : > { %v1211_v62 = vld [vmem:[#allocation2 + $0x1b0] sm:$0xff]  ;;  %1116 = vst.msk [vmem:[#allocation2 + $0xd0] sm:$0xff] %vm264_vm2, %v1051_v51  ;;  %1148 = vst.msk [vmem:[#allocation2 + $0x1d0] sm:$0xff] %vm264_vm2, %v1083_v52  ;;  %v1885_v2 = vpack.c.bf16 %v1245_v55, %v1245_v55  ;;  %v1250_v4 = vadd.f32 %v2404_v1, %v1179_v61  ;;  %v1050_v24 = vadd.f32 %v869_v20, %v354_v8  ;;  %v392_v51 = vld [vmem:[#allocation2 + $0x1f8] sm:$0xff] }
 0x111   : > { %1568 = vst.msk [vmem:[%s2417_s30 + $0x4c] sm:$0xf] %vm1548_vm4, %v1887_v53  ;;  %1600 = vst.msk [vmem:[%s2417_s30 + $0xcc] sm:$0xf] %vm1548_vm4, %v1919_v54  ;;  %v1917_v3 = vpack.c.bf16 %v1277_v56, %v1277_v56  ;;  %v1282_v5 = vadd.f32 %v2404_v1, %v1211_v62  ;;  %v1177_v10 = vld [vmem:[#allocation2 + $0xa0] sm:$0xff]  ;;  %v1082_v25 = vadd.f32 %v997_v21, %v386_v9  ;;  %v2000_v32 = vpop.f32.mrf.mxu0  ;;  %v2032_v33 = vpop.f32.mrf.mxu1  ;;  %v358_v62 = vld [vmem:[#allocation2 + $0xe8] sm:$0xff] }
 0x112   : > { %v1209_v11 = vld [vmem:[#allocation2 + $0x1a0] sm:$0xff]  ;;  %1114 = vst.msk [vmem:[#allocation2 + $0xc0] sm:$0xff] %vm264_vm2, %v1049_v63  ;;  %1146 = vst.msk [vmem:[#allocation2 + $0x1c0] sm:$0xff] %vm264_vm2, %v1081_v0  ;;  %v1890_v14 = vpack.c.bf16 %v1250_v4, %v1250_v4  ;;  %v1248_v16 = vadd.f32 %v2404_v1, %v1177_v10  ;;  %v1055_v42 = vadd.f32 %v2000_v32, %v359_v26  ;;  %v390_v63 = vld [vmem:[#allocation2 + $0x1e8] sm:$0xff] }
 0x113   : > { %1566 = vst.msk [vmem:[%s2417_s30 + $0x44] sm:$0xf] %vm1548_vm4, %v1885_v2  ;;  %1598 = vst.msk [vmem:[%s2417_s30 + $0xc4] sm:$0xf] %vm1548_vm4, %v1917_v3  ;;  %v1922_v15 = vpack.c.bf16 %v1282_v5, %v1282_v5  ;;  %v1280_v17 = vadd.f32 %v2404_v1, %v1209_v11  ;;  %v1180_v18 = vld [vmem:[#allocation2 + $0xb8] sm:$0xff]  ;;  %v1087_v43 = vadd.f32 %v2032_v33, %v391_v27  ;;  %v882_v44 = vpop.f32.mrf.mxu0  ;;  %v1010_v45 = vpop.f32.mrf.mxu1 }
 0x114   : > { %v1212_v19 = vld [vmem:[#allocation2 + $0x1b8] sm:$0xff]  ;;  %v1251_v22 = vadd.f32 %v2404_v1, %v1180_v18  ;;  %1117 = vst.msk [vmem:[#allocation2 + $0xd8] sm:$0xff] %vm264_vm2, %v1052_v12  ;;  %1149 = vst.msk [vmem:[#allocation2 + $0x1d8] sm:$0xff] %vm264_vm2, %v1084_v13  ;;  %v1888_v28 = vpack.c.bf16 %v1248_v16, %v1248_v16  ;;  %v1178_v30 = vld [vmem:[#allocation2 + $0xa8] sm:$0xff]  ;;  %v1053_v54 = vadd.f32 %v882_v44, %v357_v38 }
 0x115   : > { %v1283_v23 = vadd.f32 %v2404_v1, %v1212_v19  ;;  %1571 = vst.msk [vmem:[%s2417_s30 + $0x58] sm:$0xf] %vm1548_vm4, %v1890_v14  ;;  %1603 = vst.msk [vmem:[%s2417_s30 + $0xd8] sm:$0xf] %vm1548_vm4, %v1922_v15  ;;  %v1920_v29 = vpack.c.bf16 %v1280_v17, %v1280_v17  ;;  %v1210_v31 = vld [vmem:[#allocation2 + $0x1a8] sm:$0xff]  ;;  %v1249_v36 = vadd.f32 %v2404_v1, %v1178_v30  ;;  %v2001_v56 = vpop.f32.mrf.mxu0  ;;  %v2033_v57 = vpop.f32.mrf.mxu1 }
 0x116   : > { %v1891_v34 = vpack.c.bf16 %v1251_v22, %v1251_v22  ;;  %v1281_v37 = vadd.f32 %v2404_v1, %v1210_v31  ;;  %1115 = vst.msk [vmem:[#allocation2 + $0xc8] sm:$0xff] %vm264_vm2, %v1050_v24  ;;  %1147 = vst.msk [vmem:[#allocation2 + $0x1c8] sm:$0xff] %vm264_vm2, %v1082_v25  ;;  %v1085_v55 = vadd.f32 %v1010_v45, %v389_v39 }
 0x117   : > { %v1923_v35 = vpack.c.bf16 %v1283_v23, %v1283_v23  ;;  %1569 = vst.msk [vmem:[%s2417_s30 + $0x50] sm:$0xf] %vm1548_vm4, %v1888_v28  ;;  %1601 = vst.msk [vmem:[%s2417_s30 + $0xd0] sm:$0xf] %vm1548_vm4, %v1920_v29  ;;  %v1183_v40 = vld [vmem:[#allocation2 + $0xd0] sm:$0xff]  ;;  %v1889_v46 = vpack.c.bf16 %v1249_v36, %v1249_v36  ;;  %v1056_v3 = vadd.f32 %v2001_v56, %v360_v50  ;;  %v885_v5 = vpop.f32.mrf.mxu0  ;;  %v1013_v6 = vpop.f32.mrf.mxu1 }
 0x118   : > { %v1215_v41 = vld [vmem:[#allocation2 + $0x1d0] sm:$0xff]  ;;  %1572 = vst.msk [vmem:[%s2417_s30 + $0x5c] sm:$0xf] %vm1548_vm4, %v1891_v34  ;;  %v1921_v47 = vpack.c.bf16 %v1281_v37, %v1281_v37  ;;  %v1254_v48 = vadd.f32 %v2404_v1, %v1183_v40  ;;  %v1088_v4 = vadd.f32 %v2033_v57, %v392_v51  ;;  %v1054_v13 = vadd.f32 %v885_v5, %v358_v62 }
 0x119   : > { %1604 = vst.msk [vmem:[%s2417_s30 + $0xdc] sm:$0xf] %vm1548_vm4, %v1923_v35  ;;  %v1286_v49 = vadd.f32 %v2404_v1, %v1215_v41  ;;  %v1181_v52 = vld [vmem:[#allocation2 + $0xc0] sm:$0xff]  ;;  %1570 = vst.msk [vmem:[%s2417_s30 + $0x54] sm:$0xf] %vm1548_vm4, %v1889_v46  ;;  %v1086_v14 = vadd.f32 %v1013_v6, %v390_v63 }
 0x11a   : > { %v1213_v53 = vld [vmem:[#allocation2 + $0x1c0] sm:$0xff]  ;;  %1120 = vst.msk [vmem:[#allocation2 + $0xf0] sm:$0xff] %vm264_vm2, %v1055_v42  ;;  %1152 = vst.msk [vmem:[#allocation2 + $0x1f0] sm:$0xff] %vm264_vm2, %v1087_v43  ;;  %v1894_v58 = vpack.c.bf16 %v1254_v48, %v1254_v48  ;;  %v1252_v60 = vadd.f32 %v2404_v1, %v1181_v52 }
 0x11b   : > { %1602 = vst.msk [vmem:[%s2417_s30 + $0xd4] sm:$0xf] %vm1548_vm4, %v1921_v47  ;;  %v1926_v59 = vpack.c.bf16 %v1286_v49, %v1286_v49  ;;  %v1284_v61 = vadd.f32 %v2404_v1, %v1213_v53  ;;  %v1184_v0 = vld [vmem:[#allocation2 + $0xd8] sm:$0xff] }
 0x11c   : > { %v1216_v2 = vld [vmem:[#allocation2 + $0x1d8] sm:$0xff]  ;;  %1118 = vst.msk [vmem:[#allocation2 + $0xe0] sm:$0xff] %vm264_vm2, %v1053_v54  ;;  %1150 = vst.msk [vmem:[#allocation2 + $0x1e0] sm:$0xff] %vm264_vm2, %v1085_v55  ;;  %v1892_v7 = vpack.c.bf16 %v1252_v60, %v1252_v60  ;;  %v1255_v9 = vadd.f32 %v2404_v1, %v1184_v0 }
 0x11d   : > { %1575 = vst.msk [vmem:[%s2417_s30 + $0x68] sm:$0xf] %vm1548_vm4, %v1894_v58  ;;  %1607 = vst.msk [vmem:[%s2417_s30 + $0xe8] sm:$0xf] %vm1548_vm4, %v1926_v59  ;;  %v1924_v8 = vpack.c.bf16 %v1284_v61, %v1284_v61  ;;  %v1287_v10 = vadd.f32 %v2404_v1, %v1216_v2  ;;  %v1182_v11 = vld [vmem:[#allocation2 + $0xc8] sm:$0xff] }
 0x11e   : > { %v1214_v12 = vld [vmem:[#allocation2 + $0x1c8] sm:$0xff]  ;;  %1121 = vst.msk [vmem:[#allocation2 + $0xf8] sm:$0xff] %vm264_vm2, %v1056_v3  ;;  %1153 = vst.msk [vmem:[#allocation2 + $0x1f8] sm:$0xff] %vm264_vm2, %v1088_v4  ;;  %v1895_v15 = vpack.c.bf16 %v1255_v9, %v1255_v9  ;;  %v1253_v17 = vadd.f32 %v2404_v1, %v1182_v11 }
 0x11f   : > { %1573 = vst.msk [vmem:[%s2417_s30 + $0x60] sm:$0xf] %vm1548_vm4, %v1892_v7  ;;  %1605 = vst.msk [vmem:[%s2417_s30 + $0xe0] sm:$0xf] %vm1548_vm4, %v1924_v8  ;;  %v1927_v16 = vpack.c.bf16 %v1287_v10, %v1287_v10  ;;  %v1285_v18 = vadd.f32 %v2404_v1, %v1214_v12 }
 0x120   : > { %1119 = vst.msk [vmem:[#allocation2 + $0xe8] sm:$0xff] %vm264_vm2, %v1054_v13  ;;  %1151 = vst.msk [vmem:[#allocation2 + $0x1e8] sm:$0xff] %vm264_vm2, %v1086_v14  ;;  %v1893_v19 = vpack.c.bf16 %v1253_v17, %v1253_v17 }
 0x121   : > { %1576 = vst.msk [vmem:[%s2417_s30 + $0x6c] sm:$0xf] %vm1548_vm4, %v1895_v15  ;;  %1608 = vst.msk [vmem:[%s2417_s30 + $0xec] sm:$0xf] %vm1548_vm4, %v1927_v16  ;;  %v1925_v20 = vpack.c.bf16 %v1285_v18, %v1285_v18  ;;  %v1187_v21 = vld [vmem:[#allocation2 + $0xf0] sm:$0xff] }
 0x122   : > { %v1219_v22 = vld [vmem:[#allocation2 + $0x1f0] sm:$0xff]  ;;  %v1258_v23 = vadd.f32 %v2404_v1, %v1187_v21  ;;  %1574 = vst.msk [vmem:[%s2417_s30 + $0x64] sm:$0xf] %vm1548_vm4, %v1893_v19 }
 0x123   : > { %v1290_v24 = vadd.f32 %v2404_v1, %v1219_v22  ;;  %1606 = vst.msk [vmem:[%s2417_s30 + $0xe4] sm:$0xf] %vm1548_vm4, %v1925_v20  ;;  %v1185_v25 = vld [vmem:[#allocation2 + $0xe0] sm:$0xff] }
 0x124   : > { %v1217_v26 = vld [vmem:[#allocation2 + $0x1e0] sm:$0xff]  ;;  %v1898_v27 = vpack.c.bf16 %v1258_v23, %v1258_v23  ;;  %v1256_v29 = vadd.f32 %v2404_v1, %v1185_v25 }
 0x125   : > { %v1930_v28 = vpack.c.bf16 %v1290_v24, %v1290_v24  ;;  %v1288_v30 = vadd.f32 %v2404_v1, %v1217_v26  ;;  %v1188_v31 = vld [vmem:[#allocation2 + $0xf8] sm:$0xff] }
 0x126   : > { %v1220_v32 = vld [vmem:[#allocation2 + $0x1f8] sm:$0xff]  ;;  %1579 = vst.msk [vmem:[%s2417_s30 + $0x78] sm:$0xf] %vm1548_vm4, %v1898_v27  ;;  %v1896_v33 = vpack.c.bf16 %v1256_v29, %v1256_v29  ;;  %v1259_v35 = vadd.f32 %v2404_v1, %v1188_v31 }
 0x127   : > { %1611 = vst.msk [vmem:[%s2417_s30 + $0xf8] sm:$0xf] %vm1548_vm4, %v1930_v28  ;;  %v1928_v34 = vpack.c.bf16 %v1288_v30, %v1288_v30  ;;  %v1291_v36 = vadd.f32 %v2404_v1, %v1220_v32  ;;  %v1186_v37 = vld [vmem:[#allocation2 + $0xe8] sm:$0xff] }
 0x128   : > { %v1218_v38 = vld [vmem:[#allocation2 + $0x1e8] sm:$0xff]  ;;  %1577 = vst.msk [vmem:[%s2417_s30 + $0x70] sm:$0xf] %vm1548_vm4, %v1896_v33  ;;  %v1899_v39 = vpack.c.bf16 %v1259_v35, %v1259_v35  ;;  %v1257_v41 = vadd.f32 %v2404_v1, %v1186_v37 }
 0x129   : > { %1609 = vst.msk [vmem:[%s2417_s30 + $0xf0] sm:$0xf] %vm1548_vm4, %v1928_v34  ;;  %v1931_v40 = vpack.c.bf16 %v1291_v36, %v1291_v36  ;;  %v1289_v42 = vadd.f32 %v2404_v1, %v1218_v38 }
 0x12a   : > { %1580 = vst.msk [vmem:[%s2417_s30 + $0x7c] sm:$0xf] %vm1548_vm4, %v1899_v39  ;;  %v1897_v43 = vpack.c.bf16 %v1257_v41, %v1257_v41 }
 0x12b   : > { %1612 = vst.msk [vmem:[%s2417_s30 + $0xfc] sm:$0xf] %vm1548_vm4, %v1931_v40  ;;  %v1929_v44 = vpack.c.bf16 %v1289_v42, %v1289_v42 }
 0x12c   : > { %1578 = vst.msk [vmem:[%s2417_s30 + $0x74] sm:$0xf] %vm1548_vm4, %v1897_v43 }
 0x12d   : > { %1610 = vst.msk [vmem:[%s2417_s30 + $0xf4] sm:$0xf] %vm1548_vm4, %v1929_v44 }
 0x12e PF: > { %s13_s14 = sadd.s32 1, %s2120_s14   ;;  %s2677_s12 = smov %s2116_s13 }
 0x12f   : > { %p10_p5 = scmp.ge.s32.totalorder %s13_s14, 6   ;;  %s2678_s13 = smov %s2680_s15 }
 0x131   :  { %12 = sbr.rel (!%p10_p5) target bundleno = 2 (0x2), region = 76 }

</bundles_post_ra>
